<compile_context>
chip_gen: v7x
topology: tpu7x:2x2x1
jax: 0.10.0
libtpu: 0.0.40
codegen_flags: <defaults>
</compile_context>

<pallas_src>
import jax
import jax.numpy as jnp
from jax.experimental import pallas as pl
from jax.experimental.pallas import tpu as pltpu

# Same eps as the PyTorch module.  NOTE: 1e-44 is subnormal in f32 and TPUs
# flush subnormals to zero, so an exactly-zero probability gives +inf here
# while PyTorch (which keeps subnormals) gives ~101.3.  For strictly positive
# probabilities (e.g. softmax outputs) the results match.
EPS = 1e-44


def _nll_kernel(logits_ref, preds_ref, out_ref, gacc_ref):
    """One (row_tile, vocab_tile) grid step.

    logits_ref: (tR, tV) probabilities (native dtype) in VMEM
    preds_ref : (tR, 1) int32 target class per row; -1 = masked row
                (dropped last timestep of each sequence, or padding)
    out_ref   : (1, 1) f32 resident accumulator holding the global sum
    gacc_ref  : (tR, 1) f32 scratch: gathered probability per row
    """
    r = pl.program_id(0)
    v = pl.program_id(1)
    n_v = pl.num_programs(1)

    @pl.when(jnp.logical_and(r == 0, v == 0))
    def _init_out():
        out_ref[...] = jnp.zeros_like(out_ref)

    @pl.when(v == 0)
    def _init_gather():
        gacc_ref[...] = jnp.zeros_like(gacc_ref)

    logits = logits_ref[...].astype(jnp.float32)         # in-kernel upcast only
    preds = preds_ref[...]                               # (tR, 1) int32
    t_rows, t_vocab = logits.shape

    # Global vocab index of every lane of this tile: exactly one vocab tile can
    # match a row's target, so summing partial gathers over v is an exact gather.
    vocab_idx = (
        jax.lax.broadcasted_iota(jnp.int32, (t_rows, t_vocab), 1) + v * t_vocab
    )
    onehot = vocab_idx == preds                           # (tR, tV) bool
    gacc_ref[...] += jnp.sum(
        jnp.where(onehot, logits, 0.0), axis=-1, keepdims=True
    )

    # After the last vocab tile: log of the gathered prob (B*T logs total, not
    # B*T*V), mask dropped/padded rows, fold into the global sum.
    @pl.when(v == n_v - 1)
    def _finalize_rows():
        neg_log = -jnp.log(gacc_ref[...] + EPS)           # (tR, 1)
        valid = preds >= 0                                # sentinel rows -> 0
        out_ref[...] += jnp.sum(jnp.where(valid, neg_log, 0.0), keepdims=True)


def _round_up(x, m):
    return ((x + m - 1) // m) * m


def sequence_batch_nll_loss(logits, preds, *, tile_rows=256, tile_vocab=2048):
    """logits: (B, T, V) float probabilities (any dtype); preds: (B, T-1) ints."""
    B, T, V = logits.shape
    R = B * T

    # --- tile selection ------------------------------------------------------
    # Rows (flattened batch*time) are the sublane dim -> multiple of 8.
    tR = min(_round_up(tile_rows, 8), _round_up(R, 8))
    n_r = pl.cdiv(R, tR)
    r_pad = n_r * tR
    # Vocab is the lane dim -> multiple of 128, or the full (unaligned) vocab.
    if V % 128 == 0:
        tV = min(_round_up(tile_vocab, 128), V)
    else:
        tV = V  # small / unaligned vocab: take it whole
    n_v = pl.cdiv(V, tV)
    # Default tiles: 256*2048 f32 = 2 MiB per buffer (x2 double-buffered) --
    # fits the default scoped VMEM on v5e/v6e/v7x without raising the limit.

    # --- tiny preds preprocessing (logits are NOT copied / sliced / cast) -----
    preds = preds.astype(jnp.int32)
    # Append a -1 sentinel column for the dropped last timestep, flatten to the
    # same row order as logits.reshape(B*T, V), pad rows up to the grid size.
    # TODO(synk): out-of-range preds silently contribute -log(eps) instead of
    # raising like torch.gather.
    preds_full = jnp.concatenate([preds, jnp.full((B, 1), -1, jnp.int32)], axis=1)
    preds_flat = preds_full.reshape(R)
    preds_flat = jnp.pad(preds_flat, (0, r_pad - R), constant_values=-1)
    preds_flat = preds_flat.reshape(r_pad, 1)

    # Free reshape: collapsing contiguous leading dims is a bitcast, no HBM copy.
    logits_flat = logits.reshape(R, V)

    total = pl.pallas_call(
        _nll_kernel,
        out_shape=jax.ShapeDtypeStruct((1, 1), jnp.float32),
        grid_spec=pltpu.PrefetchScalarGridSpec(
            num_scalar_prefetch=0,
            grid=(n_r, n_v),
            in_specs=[
                pl.BlockSpec((tR, tV), lambda r, v: (r, v)),
                # preds index_map is independent of v: its tile stays resident
                # across the whole vocab sweep (no re-DMA per vocab tile).
                pl.BlockSpec((tR, 1), lambda r, v: (r, 0)),
            ],
            out_specs=pl.BlockSpec((1, 1), lambda r, v: (0, 0)),
            scratch_shapes=[pltpu.VMEM((tR, 1), jnp.float32)],
        ),
        compiler_params=pltpu.CompilerParams(
            # The (1,1) output block is revisited across both axes -> arbitrary.
            dimension_semantics=("arbitrary", "arbitrary"),
        ),
    )(logits_flat, preds_flat)

    # Divide by the true global batch size (not a tile-local one).
    return total[0, 0] / jnp.float32(B)


def _reference(logits, preds):
    lg = jnp.log(logits.astype(jnp.float32)[:, :-1, :] + EPS)
    g = jnp.take_along_axis(lg, preds[..., None].astype(jnp.int32), axis=-1)[..., 0]
    return -jnp.sum(g) / logits.shape[0]


if __name__ == "__main__":
    key = jax.random.PRNGKey(0)
    B, T, V = 2, 8, 32
    k1, k2 = jax.random.split(key)

    # Probabilities (softmax over vocab), as the module expects.
    raw = jax.random.normal(k1, (B, T, V), dtype=jnp.float32)
    probs = jax.nn.softmax(raw, axis=-1)
    preds = jax.random.randint(k2, (B, T - 1), 0, V, dtype=jnp.int32)

    loss_fn = jax.jit(sequence_batch_nll_loss)
    out = jax.block_until_ready(loss_fn(probs, preds))

    ref = _reference(probs, preds)
    assert jnp.allclose(out, ref, rtol=1e-5, atol=1e-5), (out, ref)

    print("KERNEL_OK")
</pallas_src>

<mosaic_0001>
module attributes {stable_mosaic.version = 11 : i64} {
  func.func @_nll_kernel(%arg0: i32, %arg1: i32, %arg2: memref<16x32xf32, #tpu.memory_space<vmem>>, %arg3: memref<16x1xi32, #tpu.memory_space<vmem>>, %arg4: memref<1x1xf32, #tpu.memory_space<vmem>>, %arg5: memref<16x1xf32, #tpu.memory_space<vmem>>) attributes {dimension_semantics = [#tpu.dimension_semantics<arbitrary>, #tpu.dimension_semantics<arbitrary>], iteration_bounds = array<i64: 1, 1>, scalar_prefetch = 0 : i64, scratch_operands = 1 : i64, tpu.core_type = #tpu.core_type<tc>, window_params = [{transform_indices = @transform_0, window_bounds = array<i64: 16, 32>}, {transform_indices = @transform_1, window_bounds = array<i64: 16, 1>}, {pipeline_mode = #tpu.pipeline_mode<synchronous>, transform_indices = @transform_2, window_bounds = array<i64: 1, 1>}]} {
    %c0_i32 = arith.constant 0 : i32
    %0 = arith.cmpi eq, %arg0, %c0_i32 : i32
    %c0_i32_0 = arith.constant 0 : i32
    %1 = arith.cmpi eq, %arg1, %c0_i32_0 : i32
    %2 = arith.andi %0, %1 : i1
    %3 = arith.extui %2 : i1 to i32
    %c0_i32_1 = arith.constant 0 : i32
    %4 = arith.cmpi ne, %3, %c0_i32_1 : i32
    scf.if %4 {
      %cst_14 = arith.constant 0.000000e+00 : f32
      %26 = vector.broadcast %cst_14 : f32 to vector<1x1xf32>
      %c0_15 = arith.constant 0 : index
      %c0_16 = arith.constant 0 : index
      %27 = vector.load %arg4[%c0_15, %c0_16] : memref<1x1xf32, #tpu.memory_space<vmem>>, vector<1x1xf32>
      tpu.vector_store %arg4[%c0_15, %c0_16], %26 {strides = array<i32>} : memref<1x1xf32, #tpu.memory_space<vmem>>, vector<1x1xf32>,
    } else {
    }
    %c0_i32_2 = arith.constant 0 : i32
    %5 = arith.cmpi eq, %arg1, %c0_i32_2 : i32
    %6 = arith.extui %5 : i1 to i32
    %c0_i32_3 = arith.constant 0 : i32
    %7 = arith.cmpi ne, %6, %c0_i32_3 : i32
    scf.if %7 {
      %cst_14 = arith.constant 0.000000e+00 : f32
      %26 = vector.broadcast %cst_14 : f32 to vector<16x1xf32>
      %c0_15 = arith.constant 0 : index
      %c0_16 = arith.constant 0 : index
      %27 = vector.load %arg5[%c0_15, %c0_16] : memref<16x1xf32, #tpu.memory_space<vmem>>, vector<16x1xf32>
      tpu.vector_store %arg5[%c0_15, %c0_16], %26 {strides = array<i32>} : memref<16x1xf32, #tpu.memory_space<vmem>>, vector<16x1xf32>,
    } else {
    }
    %c0 = arith.constant 0 : index
    %c0_4 = arith.constant 0 : index
    %8 = vector.load %arg2[%c0, %c0_4] : memref<16x32xf32, #tpu.memory_space<vmem>>, vector<16x32xf32>
    %c0_5 = arith.constant 0 : index
    %c0_6 = arith.constant 0 : index
    %9 = vector.load %arg3[%c0_5, %c0_6] : memref<16x1xi32, #tpu.memory_space<vmem>>, vector<16x1xi32>
    %10 = tpu.iota {dimensions = array<i32: 1>} : vector<16x32xi32>
    %c32_i32 = arith.constant 32 : i32
    %11 = arith.muli %arg1, %c32_i32 : i32
    %12 = vector.broadcast %11 : i32 to vector<16x32xi32>
    %13 = arith.addi %10, %12 : vector<16x32xi32>
    %14 = vector.broadcast %9 : vector<16x1xi32> to vector<16x32xi32>
    %15 = arith.cmpi eq, %13, %14 : vector<16x32xi32>
    %c0_7 = arith.constant 0 : index
    %c0_8 = arith.constant 0 : index
    %16 = vector.load %arg5[%c0_7, %c0_8] : memref<16x1xf32, #tpu.memory_space<vmem>>, vector<16x1xf32>
    %cst = arith.constant 0.000000e+00 : f32
    %17 = vector.broadcast %cst : f32 to vector<16x32xf32>
    %18 = arith.select %15, %8, %17 : vector<16x32xi1>, vector<16x32xf32>
    %cst_9 = arith.constant dense<0.000000e+00> : vector<16xf32>
    %19 = vector.multi_reduction <add>, %18, %cst_9 [1] : vector<16x32xf32> to vector<16xf32>
    %20 = vector.shape_cast %19 : vector<16xf32> to vector<16x1xf32>
    %21 = arith.addf %16, %20 : vector<16x1xf32>
    %c0_10 = arith.constant 0 : index
    %c0_11 = arith.constant 0 : index
    %22 = vector.load %arg5[%c0_10, %c0_11] : memref<16x1xf32, #tpu.memory_space<vmem>>, vector<16x1xf32>
    tpu.vector_store %arg5[%c0_10, %c0_11], %21 {strides = array<i32>} : memref<16x1xf32, #tpu.memory_space<vmem>>, vector<16x1xf32>,
    %c0_i32_12 = arith.constant 0 : i32
    %23 = arith.cmpi eq, %arg1, %c0_i32_12 : i32
    %24 = arith.extui %23 : i1 to i32
    %c0_i32_13 = arith.constant 0 : i32
    %25 = arith.cmpi ne, %24, %c0_i32_13 : i32
    scf.if %25 {
      %c0_14 = arith.constant 0 : index
      %c0_15 = arith.constant 0 : index
      %26 = vector.load %arg5[%c0_14, %c0_15] : memref<16x1xf32, #tpu.memory_space<vmem>>, vector<16x1xf32>
      %cst_16 = arith.constant 9.809080e-45 : f32
      %27 = vector.broadcast %cst_16 : f32 to vector<16x1xf32>
      %28 = arith.addf %26, %27 : vector<16x1xf32>
      %29 = math.log %28 : vector<16x1xf32>
      %cst_17 = arith.constant 0.000000e+00 : f32
      %30 = vector.broadcast %cst_17 : f32 to vector<16x1xf32>
      %31 = arith.subf %30, %29 : vector<16x1xf32>
      %c0_i32_18 = arith.constant 0 : i32
      %32 = vector.broadcast %c0_i32_18 : i32 to vector<16x1xi32>
      %33 = arith.cmpi sge, %9, %32 : vector<16x1xi32>
      %c0_19 = arith.constant 0 : index
      %c0_20 = arith.constant 0 : index
      %34 = vector.load %arg4[%c0_19, %c0_20] : memref<1x1xf32, #tpu.memory_space<vmem>>, vector<1x1xf32>
      %cst_21 = arith.constant 0.000000e+00 : f32
      %35 = vector.broadcast %cst_21 : f32 to vector<16x1xf32>
      %36 = arith.select %33, %31, %35 : vector<16x1xi1>, vector<16x1xf32>
      %37 = vector.shape_cast %36 : vector<16x1xf32> to vector<1x16x1xf32>
      %cst_22 = arith.constant dense<0.000000e+00> : vector<1xf32>
      %38 = vector.multi_reduction <add>, %37, %cst_22 [1, 2] : vector<1x16x1xf32> to vector<1xf32>
      %39 = vector.shape_cast %38 : vector<1xf32> to vector<1x1x1xf32>
      %40 = vector.extract %39[0, 0, 0] : f32 from vector<1x1x1xf32>
      %41 = vector.broadcast %40 : f32 to vector<1x1xf32>
      %42 = arith.addf %34, %41 : vector<1x1xf32>
      %c0_23 = arith.constant 0 : index
      %c0_24 = arith.constant 0 : index
      %43 = vector.load %arg4[%c0_23, %c0_24] : memref<1x1xf32, #tpu.memory_space<vmem>>, vector<1x1xf32>
      tpu.vector_store %arg4[%c0_23, %c0_24], %42 {strides = array<i32>} : memref<1x1xf32, #tpu.memory_space<vmem>>, vector<1x1xf32>,
    } else {
    }
    return
  }
  func.func @transform_0(%arg0: i32, %arg1: i32) -> (i32, i32) {
    %c0_i32 = arith.constant 0 : i32
    return %arg0, %arg1 : i32, i32
  }
  func.func @transform_1(%arg0: i32, %arg1: i32) -> (i32, i32) {
    %c0_i32 = arith.constant 0 : i32
    %c0_i32_0 = arith.constant 0 : i32
    return %arg0, %c0_i32 : i32, i32
  }
  func.func @transform_2(%arg0: i32, %arg1: i32) -> (i32, i32) {
    %c0_i32 = arith.constant 0 : i32
    %c0_i32_0 = arith.constant 0 : i32
    %c0_i32_1 = arith.constant 0 : i32
    return %c0_i32, %c0_i32_0 : i32, i32
  }
}

</mosaic_0001>

<bundles_post_ra>
// kernel: sequence_batch_nll_loss.1
= control target key start
LH: loop header
LB: loop body
LE: loop exit
PB: predicated region body
PF: predicated region fallthrough
CT: control target
= control target key end

     0   :  { %s191_s0 = inlined_call_operand.vmem [shape: f32[16,32], index: 0, kind: input, shape index: {}]   ;;  %s192_s1 = inlined_call_operand.vmem [shape: s32[16,1], index: 1, kind: input, shape index: {}]   ;;  %s193_s2 = inlined_call_operand.hbm [shape: f32[1,1], index: 2, kind: output, shape index: {}]  }
   0x1   :  { %v28_v0 = vld [vmem:[%s192_s1] sm:$0xff] }
   0x2   :  { %7 = vsyncpa [#allocation4], 0  ;;  %v141_v1 = vmov 0   ;;  %v29_v2 = vld [vmem:[%s192_s1 + $0x8] sm:$0xff]  ;;  %v30_v3 = vlaneseq  ;;  %v26_v5 = vld [vmem:[%s191_s0] sm:$0xff]  ;;  %vm47_vm0 = vcmask 261120  }
   0x3   :  { %112 = vset.pattern.permute.xlu0 %v141_v1  ;;  %v27_v9 = vld [vmem:[%s191_s0 + $0x8] sm:$0xff]  ;;  %vm23_vm3 = vcmask 7168   ;;  %v142_v13 = vmov 0.0   ;;  %vm72_vm4 = vcmp.ge.s32.totalorder %v28_v0, 0  ;;  %vm73_vm5 = vcmp.ge.s32.totalorder %v29_v2, 0  ;;  %s143_s0 = smov [#allocation3]  }
   0x4   :  { %36 = vperm.xlu0 %112, %v28_v0   ;;  %v31_v4 = vand.u32 127, %v30_v3  ;;  %24 = vst.msk [vmem:[#allocation2] sm:$0xff] %vm23_vm3, %v142_v13  ;;  %25 = vst.msk [vmem:[#allocation2 + $0x8] sm:$0xff] %vm23_vm3, %v142_v13  ;;  %vm18_vm6 = vcmask 0   ;;  %s99_s1 = sshll.u32 %s143_s0, 4  ;;  %s100_s1 = int_to_ptr.vmem [resolvable:$true] %s99_s1 }
   0x5   :  { %19 = vst.msk [vmem:[#allocation3] sm:$0x1] %vm18_vm6, %v142_v13  ;;  %s117_s18 = scalar_lea.vmem %s100_s1, 16  ;;  %s121_s19 = scalar_lea.vmem %s100_s1, 32 }
   0x6   :  { %p118_p0 = scmp.ne.s32.totalorder %s100_s1, %s117_s18  ;;  %p122_p1 = scmp.lt.s32.totalorder %s100_s1, %s100_s1 }
   0x7   :  { %p123_p2 = scmp.lt.s32.totalorder %s121_s19, %s117_s18 }
   0x8   :  { %39 = vperm.xlu0 %112, %v29_v2  }
   0x9   :  { %p124_p3 = por %p123_p2, %p122_p1 }
   0xb   :  { %v43_v14 = vld [vmem:[#allocation2] sm:$0xff]  ;;  %v44_v17 = vld [vmem:[#allocation2 + $0x8] sm:$0xff]  ;;  %p125_p4 = pnand %p124_p3, %p118_p0 }
   0xc   :  { %v74_v40 = vld [vmem:[#allocation3] sm:$0x1] }
  0x83   :  { %v37_v6 = vpop.permute.xlu0 %36 }
  0x84   :  { %vm41_vm1 = vcmp.eq.s32.totalorder %v31_v4, %v37_v6 }
  0x85   :  { %v45_v7 = vsel %vm41_vm1, %v26_v5, 0.0 }
  0x86   :  { %v48_v8 = vsel %vm47_vm0, %v45_v7, 0.0 }
  0x87   :  { %v40_v10 = vpop.permute.xlu0 %39  ;;  %49 = vadd.xlane.f32.xlu1 %v48_v8 }
  0x88   :  { %vm42_vm2 = vcmp.eq.s32.totalorder %v31_v4, %v40_v10 }
  0x89   :  { %v46_v11 = vsel %vm42_vm2, %v27_v9, 0.0 }
  0x8a   :  { %v51_v12 = vsel %vm47_vm0, %v46_v11, 0.0 }
  0x8b   :  { %52 = vadd.xlane.f32.xlu1 %v51_v12 }
 0x114   :  { %v50_v15 = vpop.xlane.xlu1 %49 }
 0x115   :  { %v54_v16 = vadd.f32 %v50_v15, %v43_v14 }
 0x117   :  { %57 = vst.msk [vmem:[#allocation2] sm:$0xff] %vm23_vm3, %v54_v16 }
 0x118   :  { %v53_v18 = vpop.xlane.xlu1 %52 }
 0x119   :  { %v55_v19 = vadd.f32 %v53_v18, %v44_v17 }
 0x11b   :  { %58 = vst.msk [vmem:[#allocation2 + $0x8] sm:$0xff] %vm23_vm3, %v55_v19 }
 0x11e   :  { %v62_v20 = vld [vmem:[#allocation2] sm:$0xff] }
 0x11f   :  { %113 = vlog2.f32 %v62_v20 }
 0x122   :  { %v63_v21 = vld [vmem:[#allocation2 + $0x8] sm:$0xff] }
 0x123   :  { %115 = vlog2.f32 %v63_v21 }
 0x129   :  { %v114_v22 = vpop.eup %113 }
 0x12a   :  { %v67_v23 = vmul.f32 0.6931472, %v114_v22 }
 0x12c   :  { %v70_v24 = vsub.f32 0.0, %v67_v23 }
 0x12d   :  { %v116_v25 = vpop.eup %115 }
 0x12e   :  { %v69_v26 = vmul.f32 0.6931472, %v116_v25  ;;  %v75_v28 = vsel %vm72_vm4, %v70_v24, 0.0 }
 0x12f   :  { %v77_v30 = vsel %vm23_vm3, %v75_v28, 0.0 }
 0x130   :  { %v71_v27 = vsub.f32 0.0, %v69_v26 }
 0x132   :  { %v76_v29 = vsel %vm73_vm5, %v71_v27, 0.0 }
 0x133   :  { %v78_v31 = vsel %vm23_vm3, %v76_v29, 0.0 }
 0x134   :  { %v79_v32 = vadd.f32 %v78_v31, %v77_v30 }
 0x136   :  { %80 = vadd.xlane.f32.xlu0 %v79_v32 }
 0x1c3   :  { %v81_v33 = vpop.xlane.xlu0 %80 }
 0x1c4   :  { %v82_v34 = vrot.slane %v81_v33, 4 }
 0x1c6   :  { %v83_v35 = vadd.f32 %v82_v34, %v81_v33 }
 0x1c8   :  { %v84_v36 = vrot.slane %v83_v35, 2 }
 0x1ca   :  { %v85_v37 = vadd.f32 %v84_v36, %v83_v35 }
 0x1cc   :  { %v86_v38 = vrot.slane %v85_v37, 1 }
 0x1ce   :  { %v87_v39 = vadd.f32 %v86_v38, %v85_v37 }
 0x1d0   :  { %107 = vpush %v87_v39 }
 0x201   :  { %s108_s17 = spop %107 }
 0x202   :  { %v89_v41 = vstv %s108_s17 }
 0x203   :  { %v90_v42 = vadd.f32 %v89_v41, %v74_v40 }
 0x205   :  { %92 = vst.msk [vmem:[#allocation3] sm:$0x1] %vm18_vm6, %v90_v42 }
 0x206   :  { %128 = shalt.err (!%p125_p4)
}
 0x207   :  { %s129_s22 = scalar_lea.hbm %s193_s2, 16 }
 0x208   :  { %p130_p5 = scmp.ne.s32.totalorder %s193_s2, %s129_s22  ;;  %p133_p6 = scmp.lt.u32.totalorder %s129_s22, %s193_s2 }
 0x20a   :  { %p135_p7 = pnand %p133_p6, %p130_p5 }
 0x20c   :  { %138 = shalt.err (!%p135_p7)
}
 0x20d   :  { %102 = dma.vmem_to_hbm [thread:$0]  %s100_s1, 16, %s193_s2, [#allocation4]  }
 0x20e   :  { %139 = dma.done.wait [#allocation4], 16  }
 0x20f   :  { %140 = vsyncadd [#allocation4], 4294967280 }
 0x210   :  { %106 = vsyncpa [#allocation4], 1 }

</bundles_post_ra>
